<compile_context>
chip_gen: v5e
topology: v5e:2x2
jax: 0.10.0
libtpu: 0.0.40
codegen_flags: <defaults>
</compile_context>

<pallas_src>
import functools

import jax
import jax.numpy as jnp
from jax import lax
from jax.experimental import pallas as pl
from jax.experimental.pallas import tpu as pltpu


def _softplus_f32(x):
    # numerically stable softplus: max(x,0) + log(1 + exp(-|x|))
    return jnp.maximum(x, 0.0) + jnp.log(1.0 + jnp.exp(-jnp.abs(x)))


def _fused_head(h_f32, w_out, b_out_row, z_dim, min_std, compute_dtype):
    """Single (h_dim, 2*z_dim) matmul; softplus/min_std applied to std half."""
    out = jnp.dot(h_f32.astype(compute_dtype), w_out,
                  preferred_element_type=jnp.float32)
    out = out + b_out_row                                   # (TB, 2*z_dim)
    col = lax.broadcasted_iota(jnp.int32, out.shape, 1)
    std = _softplus_f32(out + 0.55) + min_std
    return jnp.where(col >= z_dim, std, out)


def _resident_kernel(n_hidden, z_dim, min_std, compute_dtype,
                     x_ref, wh_ref, bh_ref, wout_ref, bout_ref, out_ref):
    """Weight-resident path: one batch tile, all layers in one grid step.

    x_ref    : (TB, h_dim)
    wh_ref   : (n_hidden, h_dim, h_dim)   resident hidden weights
    bh_ref   : (n_hidden, 1, h_dim)       resident hidden biases (f32)
    wout_ref : (h_dim, 2*z_dim)           fused head weight
    bout_ref : (1, 2*z_dim)               fused head bias (f32)
    out_ref  : (TB, 2*z_dim)              [mu | std]
    """
    h = x_ref[...].astype(jnp.float32)

    def layer(i, h):
        acc = jnp.dot(h.astype(compute_dtype), wh_ref[i],
                      preferred_element_type=jnp.float32)
        return jnp.maximum(acc + bh_ref[i], 0.0)

    if n_hidden <= 4:
        for i in range(n_hidden):          # shallow: unroll for LLO visibility
            h = layer(i, h)
    else:                                  # deep: keep vreg pressure flat
        h = lax.fori_loop(0, n_hidden, layer, h)

    out_ref[...] = _fused_head(h, wout_ref[...], bout_ref[...],
                               z_dim, min_std, compute_dtype
                               ).astype(out_ref.dtype)


def _streaming_kernel(n_hidden, z_dim, min_std, compute_dtype,
                      x_ref, wh_ref, bh_ref, wout_ref, bout_ref, out_ref,
                      h_scr):
    """Layer-streaming path: grid=(batch_tiles, n_hidden); hidden weights
    stream per layer step, activation stays in VMEM scratch."""
    l = pl.program_id(1)

    @pl.when(l == 0)
    def _():
        h_scr[...] = x_ref[...].astype(jnp.float32)

    acc = jnp.dot(h_scr[...].astype(compute_dtype), wh_ref[0],
                  preferred_element_type=jnp.float32)
    h_scr[...] = jnp.maximum(acc + bh_ref[0], 0.0)

    @pl.when(l == n_hidden - 1)
    def _():
        out_ref[...] = _fused_head(h_scr[...], wout_ref[...], bout_ref[...],
                                   z_dim, min_std, compute_dtype
                                   ).astype(out_ref.dtype)


def pack_transition_params(weights, biases, *, compute_dtype=jnp.float32):
    """Pre-pack parameters ONCE (hoists per-call stack/cast/split out of the
    forward wrapper -> no repeated weight-copy HBM traffic)."""
    n_hidden = len(weights) - 1
    assert n_hidden >= 1
    h_dim = weights[0].shape[0]
    w_hidden = jnp.stack([w.astype(compute_dtype) for w in weights[:-1]], axis=0)
    b_hidden = jnp.stack([b.astype(jnp.float32) for b in biases[:-1]],
                         axis=0).reshape(n_hidden, 1, h_dim)
    w_out = weights[-1].astype(compute_dtype)                 # (h_dim, 2*z_dim)
    b_out = biases[-1].astype(jnp.float32).reshape(1, -1)     # (1, 2*z_dim)
    return {"w_hidden": w_hidden, "b_hidden": b_hidden,
            "w_out": w_out, "b_out": b_out, "compute_dtype": compute_dtype}


def _round8(v):
    return max(8, (int(v) // 8) * 8)


def transition_model_forward(h_state, packed, *, z_dim, min_std,
                             force_stream_layers=False):
    """TransitionModel forward in a single Pallas kernel.

    Args:
      h_state: (B, h_dim) float32 or bfloat16 activations.
      packed:  output of pack_transition_params.
    Returns:
      (mu, std), each (B, z_dim) float32.
    """
    B, h_dim = h_state.shape
    w_hidden, b_hidden = packed["w_hidden"], packed["b_hidden"]
    w_out, b_out = packed["w_out"], packed["b_out"]
    compute_dtype = packed["compute_dtype"]
    n_hidden = w_hidden.shape[0]
    out_dim = w_out.shape[1]
    assert out_dim == 2 * z_dim

    x = h_state
    if x.dtype not in (jnp.float32, jnp.bfloat16):
        x = x.astype(jnp.float32)
    in_itemsize = x.dtype.itemsize
    csize = jnp.dtype(compute_dtype).itemsize

    # ----- VMEM budget (per-core; ~85% of physical, chip-aware) --------------
    try:
        vmem_cap = int(pltpu.get_tpu_info().vmem_capacity_bytes)
    except Exception:
        vmem_cap = 64 * 2**20            # conservative fallback (v7x per-TC)
    budget = int(vmem_cap * 0.85)

    head_bytes = w_out.size * csize + b_out.size * 4
    param_bytes = (w_hidden.size * csize + b_hidden.size * 4 + head_bytes)

    # Per-batch-row streamed VMEM (double-buffered in/out tiles + working room).
    per_row = (2 * h_dim * in_itemsize          # activation tile (x2 buffers)
               + 2 * out_dim * 4                # fused output tile (x2 buffers)
               + 4 * h_dim * 4)                 # working-activation headroom

    b8 = ((B + 7) // 8) * 8
    stream_layers = force_stream_layers or (param_bytes + 8 * per_row > budget)

    if stream_layers:
        # Resident: head params + one double-buffered streamed hidden layer.
        resident = head_bytes + 2 * (h_dim * h_dim * csize + h_dim * 4)
        per_row_s = per_row + h_dim * 4         # + activation scratch
        avail = max(budget - resident, 8 * per_row_s)
        tb_vmem = _round8(avail // per_row_s)
    else:
        avail = max(budget - param_bytes, 8 * per_row)
        tb_vmem = _round8(avail // per_row)

    # >= 4 grid steps along batch when the batch allows (v7x megacore + pipeline).
    tb_split = ((((b8 + 3) // 4) + 7) // 8) * 8
    tb = _round8(min(tb_vmem, tb_split, b8))

    b_pad = -(-B // tb) * tb
    if b_pad != B:
        x = jnp.pad(x, ((0, b_pad - B), (0, 0)))
    nb = b_pad // tb

    # ----- cost estimate ------------------------------------------------------
    flops = int(2 * b_pad * h_dim * (n_hidden * h_dim + out_dim))
    transcendentals = int(2 * b_pad * out_dim)          # exp + log per element
    weight_reads = param_bytes * (nb if stream_layers else 1)
    bytes_accessed = int(b_pad * h_dim * in_itemsize + b_pad * out_dim * 4
                         + weight_reads)

    def _call(single_buffer_params):
        def pspec(shape, imap):
            if single_buffer_params:
                return pl.BlockSpec(shape, imap, pipeline_mode=pl.Buffered(1))
            return pl.BlockSpec(shape, imap)

        if not stream_layers:
            kernel = functools.partial(_resident_kernel, n_hidden, z_dim,
                                       float(min_std), compute_dtype)
            grid = (nb,)
            in_specs = [
                pl.BlockSpec((tb, h_dim), lambda i: (i, 0)),          # streamed
                pspec((n_hidden, h_dim, h_dim), lambda i: (0, 0, 0)),  # resident
                pspec((n_hidden, 1, h_dim), lambda i: (0, 0, 0)),
                pspec((h_dim, out_dim), lambda i: (0, 0)),
                pspec((1, out_dim), lambda i: (0, 0)),
            ]
            out_specs = pl.BlockSpec((tb, out_dim), lambda i: (i, 0))
            scratch_shapes = []
            dims = ("parallel",)
        else:
            kernel = functools.partial(_streaming_kernel, n_hidden, z_dim,
                                       float(min_std), compute_dtype)
            grid = (nb, n_hidden)
            in_specs = [
                pl.BlockSpec((tb, h_dim), lambda i, l: (i, 0)),
                pl.BlockSpec((1, h_dim, h_dim), lambda i, l: (l, 0, 0)),  # streams
                pl.BlockSpec((1, 1, h_dim), lambda i, l: (l, 0, 0)),
                pspec((h_dim, out_dim), lambda i, l: (0, 0)),             # resident
                pspec((1, out_dim), lambda i, l: (0, 0)),
            ]
            out_specs = pl.BlockSpec((tb, out_dim), lambda i, l: (i, 0))
            scratch_shapes = [pltpu.VMEM((tb, h_dim), jnp.float32)]
            dims = ("parallel", "arbitrary")

        return pl.pallas_call(
            kernel,
            out_shape=jax.ShapeDtypeStruct((b_pad, out_dim), jnp.float32),
            grid=grid,
            in_specs=in_specs,
            out_specs=out_specs,
            scratch_shapes=scratch_shapes,
            compiler_params=pltpu.CompilerParams(
                dimension_semantics=dims,
                vmem_limit_bytes=budget,
            ),
            cost_estimate=pl.CostEstimate(flops=flops,
                                          transcendentals=transcendentals,
                                          bytes_accessed=bytes_accessed),
        )(x, w_hidden, b_hidden, w_out, b_out)

    try:
        out = _call(True)      # parameters single-buffered (halves their VMEM)
    except Exception:
        out = _call(False)     # fallback if Buffered(1) is rejected

    mu = out[:B, :z_dim]
    std = out[:B, z_dim:]
    return mu, std


def init_transition_params(key, h_dim, z_dim, n_ff_layers):
    """Deterministic PyTorch-style (uniform +/- 1/sqrt(fan_in)) init.

    Layer dims (matching FeedForwardNet):
      to_hidden:   h_dim -> h_dim   (+ReLU)
      hidden x(n_ff_layers-1): h_dim -> h_dim (+ReLU)
      from_hidden: h_dim -> 2*z_dim
    """
    dims = [(h_dim, h_dim)] * n_ff_layers + [(h_dim, 2 * z_dim)]
    weights, biases = [], []
    for (fan_in, fan_out) in dims:
        key, kw, kb = jax.random.split(key, 3)
        bound = 1.0 / (fan_in ** 0.5)
        w = jax.random.uniform(kw, (fan_in, fan_out), jnp.float32, -bound, bound)
        b = jax.random.uniform(kb, (fan_out,), jnp.float32, -bound, bound)
        weights.append(w)
        biases.append(b)
    return weights, biases


def _reference_forward(h_state, weights, biases, z_dim, min_std):
    h = h_state
    for w, b in zip(weights[:-1], biases[:-1]):
        h = jnp.maximum(h @ w + b, 0.0)
    out = h @ weights[-1] + biases[-1]
    mu, pre_std = out[:, :z_dim], out[:, z_dim:]
    std = jax.nn.softplus(pre_std + 0.55) + min_std
    return mu, std


if __name__ == "__main__":
    # small, deterministic config
    params = {"h_dim": 32, "z_dim": 16, "n_ff_layers": 3, "min_std": 0.1}
    B = 8

    key = jax.random.PRNGKey(0)
    key, kx = jax.random.split(key)
    h_state = jax.random.normal(kx, (B, params["h_dim"]), jnp.float32)

    weights, biases = init_transition_params(
        key, params["h_dim"], params["z_dim"], params["n_ff_layers"]
    )

    mu_ref, std_ref = _reference_forward(
        h_state, weights, biases, params["z_dim"], params["min_std"]
    )

    # f32 MXU operands — tight check against pure-JAX reference
    packed_f32 = pack_transition_params(weights, biases, compute_dtype=jnp.float32)
    mu, std = transition_model_forward(
        h_state, packed_f32, z_dim=params["z_dim"], min_std=params["min_std"]
    )
    jax.block_until_ready((mu, std))
    assert mu.shape == (B, params["z_dim"]) and std.shape == (B, params["z_dim"])
    assert jnp.allclose(mu, mu_ref, atol=1e-5, rtol=1e-5)
    assert jnp.allclose(std, std_ref, atol=1e-5, rtol=1e-5)
    assert bool(jnp.all(std > 0))

    # bf16 MXU operands, f32 accumulation — loose check
    packed_bf16 = pack_transition_params(weights, biases, compute_dtype=jnp.bfloat16)
    mu_bf, std_bf = transition_model_forward(
        h_state, packed_bf16, z_dim=params["z_dim"], min_std=params["min_std"]
    )
    jax.block_until_ready((mu_bf, std_bf))
    assert jnp.allclose(mu_bf, mu_ref, atol=5e-2, rtol=5e-2)
    assert jnp.allclose(std_bf, std_ref, atol=5e-2, rtol=5e-2)

    # batch not a multiple of the sublane quantum (exercises padding + multi-tile grid)
    h2 = jax.random.normal(jax.random.PRNGKey(1), (12, params["h_dim"]), jnp.float32)
    mu2_ref, std2_ref = _reference_forward(
        h2, weights, biases, params["z_dim"], params["min_std"]
    )
    mu2, std2 = transition_model_forward(
        h2, packed_f32, z_dim=params["z_dim"], min_std=params["min_std"]
    )
    jax.block_until_ready((mu2, std2))
    assert mu2.shape == (12, params["z_dim"])
    assert jnp.allclose(mu2, mu2_ref, atol=1e-5, rtol=1e-5)
    assert jnp.allclose(std2, std2_ref, atol=1e-5, rtol=1e-5)

    # layer-streaming fallback path (v7x large-weight configs) — correctness check
    mu3, std3 = transition_model_forward(
        h2, packed_f32, z_dim=params["z_dim"], min_std=params["min_std"],
        force_stream_layers=True,
    )
    jax.block_until_ready((mu3, std3))
    assert jnp.allclose(mu3, mu2_ref, atol=1e-5, rtol=1e-5)
    assert jnp.allclose(std3, std2_ref, atol=1e-5, rtol=1e-5)

    # TODO(synk): Independent(Normal(mu, std)) is a host-side distribution object;
    # the kernel returns (mu, std) which fully parameterize it.
    print("KERNEL_OK")
</pallas_src>

<mosaic_0001>
module attributes {stable_mosaic.version = 11 : i64} {
  func.func @_resident_kernel(%arg0: i32, %arg1: memref<8x32xf32, #tpu.memory_space<vmem>>, %arg2: memref<3x32x32xf32, #tpu.memory_space<vmem>>, %arg3: memref<3x1x32xf32, #tpu.memory_space<vmem>>, %arg4: memref<32x32xf32, #tpu.memory_space<vmem>>, %arg5: memref<1x32xf32, #tpu.memory_space<vmem>>, %arg6: memref<8x32xf32, #tpu.memory_space<vmem>>) attributes {dimension_semantics = [#tpu.dimension_semantics<parallel>], iteration_bounds = array<i64: 1>, scalar_prefetch = 0 : i64, scratch_operands = 0 : i64, tpu.core_type = #tpu.core_type<tc>, window_params = [{transform_indices = @transform_0, window_bounds = array<i64: 8, 32>}, {pipeline_mode = #tpu.pipeline_mode<synchronous>, transform_indices = @transform_1, window_bounds = array<i64: 3, 32, 32>}, {pipeline_mode = #tpu.pipeline_mode<synchronous>, transform_indices = @transform_2, window_bounds = array<i64: 3, 1, 32>}, {pipeline_mode = #tpu.pipeline_mode<synchronous>, transform_indices = @transform_3, window_bounds = array<i64: 32, 32>}, {pipeline_mode = #tpu.pipeline_mode<synchronous>, transform_indices = @transform_4, window_bounds = array<i64: 1, 32>}, {transform_indices = @transform_5, window_bounds = array<i64: 8, 32>}]} {
    %c0 = arith.constant 0 : index
    %c0_0 = arith.constant 0 : index
    %0 = vector.load %arg1[%c0, %c0_0] : memref<8x32xf32, #tpu.memory_space<vmem>>, vector<8x32xf32>
    %c0_1 = arith.constant 0 : index
    %c0_2 = arith.constant 0 : index
    %c0_3 = arith.constant 0 : index
    %1 = vector.load %arg2[%c0_1, %c0_2, %c0_3] : memref<3x32x32xf32, #tpu.memory_space<vmem>>, vector<1x32x32xf32>
    %2 = vector.shape_cast %1 : vector<1x32x32xf32> to vector<32x32xf32>
    %cst = arith.constant dense<0.000000e+00> : vector<8x32xf32>
    %3 = tpu.matmul %0, %2, %cst {dimension_numbers = #tpu.dot_dimension_numbers<[1], [0], [0], [1], [0, 0, 1, 1], [], []>} : vector<8x32xf32>, vector<32x32xf32>, vector<8x32xf32> -> vector<8x32xf32>
    %c0_4 = arith.constant 0 : index
    %c0_5 = arith.constant 0 : index
    %c0_6 = arith.constant 0 : index
    %4 = vector.load %arg3[%c0_4, %c0_5, %c0_6] : memref<3x1x32xf32, #tpu.memory_space<vmem>>, vector<1x1x32xf32>
    %5 = vector.shape_cast %4 : vector<1x1x32xf32> to vector<1x32xf32>
    %6 = vector.broadcast %5 : vector<1x32xf32> to vector<8x32xf32>
    %7 = arith.addf %3, %6 : vector<8x32xf32>
    %cst_7 = arith.constant 0.000000e+00 : f32
    %8 = vector.broadcast %cst_7 : f32 to vector<8x32xf32>
    %9 = arith.maximumf %7, %8 : vector<8x32xf32>
    %c1 = arith.constant 1 : index
    %c0_8 = arith.constant 0 : index
    %c0_9 = arith.constant 0 : index
    %10 = vector.load %arg2[%c1, %c0_8, %c0_9] : memref<3x32x32xf32, #tpu.memory_space<vmem>>, vector<1x32x32xf32>
    %11 = vector.shape_cast %10 : vector<1x32x32xf32> to vector<32x32xf32>
    %cst_10 = arith.constant dense<0.000000e+00> : vector<8x32xf32>
    %12 = tpu.matmul %9, %11, %cst_10 {dimension_numbers = #tpu.dot_dimension_numbers<[1], [0], [0], [1], [0, 0, 1, 1], [], []>} : vector<8x32xf32>, vector<32x32xf32>, vector<8x32xf32> -> vector<8x32xf32>
    %c1_11 = arith.constant 1 : index
    %c0_12 = arith.constant 0 : index
    %c0_13 = arith.constant 0 : index
    %13 = vector.load %arg3[%c1_11, %c0_12, %c0_13] : memref<3x1x32xf32, #tpu.memory_space<vmem>>, vector<1x1x32xf32>
    %14 = vector.shape_cast %13 : vector<1x1x32xf32> to vector<1x32xf32>
    %15 = vector.broadcast %14 : vector<1x32xf32> to vector<8x32xf32>
    %16 = arith.addf %12, %15 : vector<8x32xf32>
    %cst_14 = arith.constant 0.000000e+00 : f32
    %17 = vector.broadcast %cst_14 : f32 to vector<8x32xf32>
    %18 = arith.maximumf %16, %17 : vector<8x32xf32>
    %c2 = arith.constant 2 : index
    %c0_15 = arith.constant 0 : index
    %c0_16 = arith.constant 0 : index
    %19 = vector.load %arg2[%c2, %c0_15, %c0_16] : memref<3x32x32xf32, #tpu.memory_space<vmem>>, vector<1x32x32xf32>
    %20 = vector.shape_cast %19 : vector<1x32x32xf32> to vector<32x32xf32>
    %cst_17 = arith.constant dense<0.000000e+00> : vector<8x32xf32>
    %21 = tpu.matmul %18, %20, %cst_17 {dimension_numbers = #tpu.dot_dimension_numbers<[1], [0], [0], [1], [0, 0, 1, 1], [], []>} : vector<8x32xf32>, vector<32x32xf32>, vector<8x32xf32> -> vector<8x32xf32>
    %c2_18 = arith.constant 2 : index
    %c0_19 = arith.constant 0 : index
    %c0_20 = arith.constant 0 : index
    %22 = vector.load %arg3[%c2_18, %c0_19, %c0_20] : memref<3x1x32xf32, #tpu.memory_space<vmem>>, vector<1x1x32xf32>
    %23 = vector.shape_cast %22 : vector<1x1x32xf32> to vector<1x32xf32>
    %24 = vector.broadcast %23 : vector<1x32xf32> to vector<8x32xf32>
    %25 = arith.addf %21, %24 : vector<8x32xf32>
    %cst_21 = arith.constant 0.000000e+00 : f32
    %26 = vector.broadcast %cst_21 : f32 to vector<8x32xf32>
    %27 = arith.maximumf %25, %26 : vector<8x32xf32>
    %c0_22 = arith.constant 0 : index
    %c0_23 = arith.constant 0 : index
    %28 = vector.load %arg4[%c0_22, %c0_23] : memref<32x32xf32, #tpu.memory_space<vmem>>, vector<32x32xf32>
    %c0_24 = arith.constant 0 : index
    %c0_25 = arith.constant 0 : index
    %29 = vector.load %arg5[%c0_24, %c0_25] : memref<1x32xf32, #tpu.memory_space<vmem>>, vector<1x32xf32>
    %cst_26 = arith.constant dense<0.000000e+00> : vector<8x32xf32>
    %30 = tpu.matmul %27, %28, %cst_26 {dimension_numbers = #tpu.dot_dimension_numbers<[1], [0], [0], [1], [0, 0, 1, 1], [], []>} : vector<8x32xf32>, vector<32x32xf32>, vector<8x32xf32> -> vector<8x32xf32>
    %31 = vector.broadcast %29 : vector<1x32xf32> to vector<8x32xf32>
    %32 = arith.addf %30, %31 : vector<8x32xf32>
    %33 = tpu.iota {dimensions = array<i32: 1>} : vector<8x32xi32>
    %cst_27 = arith.constant 5.500000e-01 : f32
    %34 = vector.broadcast %cst_27 : f32 to vector<8x32xf32>
    %35 = arith.addf %32, %34 : vector<8x32xf32>
    %cst_28 = arith.constant 0.000000e+00 : f32
    %36 = vector.broadcast %cst_28 : f32 to vector<8x32xf32>
    %37 = arith.maximumf %35, %36 : vector<8x32xf32>
    %38 = math.absf %35 : vector<8x32xf32>
    %cst_29 = arith.constant 0.000000e+00 : f32
    %39 = vector.broadcast %cst_29 : f32 to vector<8x32xf32>
    %40 = arith.subf %39, %38 : vector<8x32xf32>
    %41 = math.exp %40 : vector<8x32xf32>
    %cst_30 = arith.constant 1.000000e+00 : f32
    %42 = vector.broadcast %cst_30 : f32 to vector<8x32xf32>
    %43 = arith.addf %42, %41 : vector<8x32xf32>
    %44 = math.log %43 : vector<8x32xf32>
    %45 = arith.addf %37, %44 : vector<8x32xf32>
    %cst_31 = arith.constant 1.000000e-01 : f32
    %46 = vector.broadcast %cst_31 : f32 to vector<8x32xf32>
    %47 = arith.addf %45, %46 : vector<8x32xf32>
    %c16_i32 = arith.constant 16 : i32
    %48 = vector.broadcast %c16_i32 : i32 to vector<8x32xi32>
    %49 = arith.cmpi sge, %33, %48 : vector<8x32xi32>
    %50 = arith.select %49, %47, %32 : vector<8x32xi1>, vector<8x32xf32>
    %c0_32 = arith.constant 0 : index
    %c0_33 = arith.constant 0 : index
    %51 = vector.load %arg6[%c0_32, %c0_33] : memref<8x32xf32, #tpu.memory_space<vmem>>, vector<8x32xf32>
    tpu.vector_store %arg6[%c0_32, %c0_33], %50 {strides = array<i32>} : memref<8x32xf32, #tpu.memory_space<vmem>>, vector<8x32xf32>,
    return
  }
  func.func @transform_0(%arg0: i32) -> (i32, i32) {
    %c0_i32 = arith.constant 0 : i32
    %c0_i32_0 = arith.constant 0 : i32
    return %arg0, %c0_i32 : i32, i32
  }
  func.func @transform_1(%arg0: i32) -> (i32, i32, i32) {
    %c0_i32 = arith.constant 0 : i32
    %c0_i32_0 = arith.constant 0 : i32
    %c0_i32_1 = arith.constant 0 : i32
    %c0_i32_2 = arith.constant 0 : i32
    return %c0_i32, %c0_i32_0, %c0_i32_1 : i32, i32, i32
  }
  func.func @transform_2(%arg0: i32) -> (i32, i32, i32) {
    %c0_i32 = arith.constant 0 : i32
    %c0_i32_0 = arith.constant 0 : i32
    %c0_i32_1 = arith.constant 0 : i32
    %c0_i32_2 = arith.constant 0 : i32
    return %c0_i32, %c0_i32_0, %c0_i32_1 : i32, i32, i32
  }
  func.func @transform_3(%arg0: i32) -> (i32, i32) {
    %c0_i32 = arith.constant 0 : i32
    %c0_i32_0 = arith.constant 0 : i32
    %c0_i32_1 = arith.constant 0 : i32
    return %c0_i32, %c0_i32_0 : i32, i32
  }
  func.func @transform_4(%arg0: i32) -> (i32, i32) {
    %c0_i32 = arith.constant 0 : i32
    %c0_i32_0 = arith.constant 0 : i32
    %c0_i32_1 = arith.constant 0 : i32
    return %c0_i32, %c0_i32_0 : i32, i32
  }
  func.func @transform_5(%arg0: i32) -> (i32, i32) {
    %c0_i32 = arith.constant 0 : i32
    %c0_i32_0 = arith.constant 0 : i32
    return %arg0, %c0_i32 : i32, i32
  }
}

module attributes {stable_mosaic.version = 11 : i64} {
  func.func @_resident_kernel(%arg0: i32, %arg1: memref<8x32xf32, #tpu.memory_space<vmem>>, %arg2: memref<3x32x32xf32, #tpu.memory_space<vmem>>, %arg3: memref<3x1x32xf32, #tpu.memory_space<vmem>>, %arg4: memref<32x32xf32, #tpu.memory_space<vmem>>, %arg5: memref<1x32xf32, #tpu.memory_space<vmem>>, %arg6: memref<8x32xf32, #tpu.memory_space<vmem>>) attributes {dimension_semantics = [#tpu.dimension_semantics<parallel>], iteration_bounds = array<i64: 1>, scalar_prefetch = 0 : i64, scratch_operands = 0 : i64, tpu.core_type = #tpu.core_type<tc>, window_params = [{transform_indices = @transform_0, window_bounds = array<i64: 8, 32>}, {pipeline_mode = #tpu.pipeline_mode<synchronous>, transform_indices = @transform_1, window_bounds = array<i64: 3, 32, 32>}, {pipeline_mode = #tpu.pipeline_mode<synchronous>, transform_indices = @transform_2, window_bounds = array<i64: 3, 1, 32>}, {pipeline_mode = #tpu.pipeline_mode<synchronous>, transform_indices = @transform_3, window_bounds = array<i64: 32, 32>}, {pipeline_mode = #tpu.pipeline_mode<synchronous>, transform_indices = @transform_4, window_bounds = array<i64: 1, 32>}, {transform_indices = @transform_5, window_bounds = array<i64: 8, 32>}]} {
    %c0 = arith.constant 0 : index
    %c0_0 = arith.constant 0 : index
    %0 = vector.load %arg1[%c0, %c0_0] : memref<8x32xf32, #tpu.memory_space<vmem>>, vector<8x32xf32>
    %c0_1 = arith.constant 0 : index
    %c0_2 = arith.constant 0 : index
    %c0_3 = arith.constant 0 : index
    %1 = vector.load %arg2[%c0_1, %c0_2, %c0_3] : memref<3x32x32xf32, #tpu.memory_space<vmem>>, vector<1x32x32xf32>
    %2 = vector.shape_cast %1 : vector<1x32x32xf32> to vector<32x32xf32>
    %cst = arith.constant dense<0.000000e+00> : vector<8x32xf32>
    %3 = tpu.matmul %0, %2, %cst {dimension_numbers = #tpu.dot_dimension_numbers<[1], [0], [0], [1], [0, 0, 1, 1], [], []>} : vector<8x32xf32>, vector<32x32xf32>, vector<8x32xf32> -> vector<8x32xf32>
    %c0_4 = arith.constant 0 : index
    %c0_5 = arith.constant 0 : index
    %c0_6 = arith.constant 0 : index
    %4 = vector.load %arg3[%c0_4, %c0_5, %c0_6] : memref<3x1x32xf32, #tpu.memory_space<vmem>>, vector<1x1x32xf32>
    %5 = vector.shape_cast %4 : vector<1x1x32xf32> to vector<1x32xf32>
    %6 = vector.broadcast %5 : vector<1x32xf32> to vector<8x32xf32>
    %7 = arith.addf %3, %6 : vector<8x32xf32>
    %cst_7 = arith.constant 0.000000e+00 : f32
    %8 = vector.broadcast %cst_7 : f32 to vector<8x32xf32>
    %9 = arith.maximumf %7, %8 : vector<8x32xf32>
    %c1 = arith.constant 1 : index
    %c0_8 = arith.constant 0 : index
    %c0_9 = arith.constant 0 : index
    %10 = vector.load %arg2[%c1, %c0_8, %c0_9] : memref<3x32x32xf32, #tpu.memory_space<vmem>>, vector<1x32x32xf32>
    %11 = vector.shape_cast %10 : vector<1x32x32xf32> to vector<32x32xf32>
    %cst_10 = arith.constant dense<0.000000e+00> : vector<8x32xf32>
    %12 = tpu.matmul %9, %11, %cst_10 {dimension_numbers = #tpu.dot_dimension_numbers<[1], [0], [0], [1], [0, 0, 1, 1], [], []>} : vector<8x32xf32>, vector<32x32xf32>, vector<8x32xf32> -> vector<8x32xf32>
    %c1_11 = arith.constant 1 : index
    %c0_12 = arith.constant 0 : index
    %c0_13 = arith.constant 0 : index
    %13 = vector.load %arg3[%c1_11, %c0_12, %c0_13] : memref<3x1x32xf32, #tpu.memory_space<vmem>>, vector<1x1x32xf32>
    %14 = vector.shape_cast %13 : vector<1x1x32xf32> to vector<1x32xf32>
    %15 = vector.broadcast %14 : vector<1x32xf32> to vector<8x32xf32>
    %16 = arith.addf %12, %15 : vector<8x32xf32>
    %cst_14 = arith.constant 0.000000e+00 : f32
    %17 = vector.broadcast %cst_14 : f32 to vector<8x32xf32>
    %18 = arith.maximumf %16, %17 : vector<8x32xf32>
    %c2 = arith.constant 2 : index
    %c0_15 = arith.constant 0 : index
    %c0_16 = arith.constant 0 : index
    %19 = vector.load %arg2[%c2, %c0_15, %c0_16] : memref<3x32x32xf32, #tpu.memory_space<vmem>>, vector<1x32x32xf32>
    %20 = vector.shape_cast %19 : vector<1x32x32xf32> to vector<32x32xf32>
    %cst_17 = arith.constant dense<0.000000e+00> : vector<8x32xf32>
    %21 = tpu.matmul %18, %20, %cst_17 {dimension_numbers = #tpu.dot_dimension_numbers<[1], [0], [0], [1], [0, 0, 1, 1], [], []>} : vector<8x32xf32>, vector<32x32xf32>, vector<8x32xf32> -> vector<8x32xf32>
    %c2_18 = arith.constant 2 : index
    %c0_19 = arith.constant 0 : index
    %c0_20 = arith.constant 0 : index
    %22 = vector.load %arg3[%c2_18, %c0_19, %c0_20] : memref<3x1x32xf32, #tpu.memory_space<vmem>>, vector<1x1x32xf32>
    %23 = vector.shape_cast %22 : vector<1x1x32xf32> to vector<1x32xf32>
    %24 = vector.broadcast %23 : vector<1x32xf32> to vector<8x32xf32>
    %25 = arith.addf %21, %24 : vector<8x32xf32>
    %cst_21 = arith.constant 0.000000e+00 : f32
    %26 = vector.broadcast %cst_21 : f32 to vector<8x32xf32>
    %27 = arith.maximumf %25, %26 : vector<8x32xf32>
    %c0_22 = arith.constant 0 : index
    %c0_23 = arith.constant 0 : index
    %28 = vector.load %arg4[%c0_22, %c0_23] : memref<32x32xf32, #tpu.memory_space<vmem>>, vector<32x32xf32>
    %c0_24 = arith.constant 0 : index
    %c0_25 = arith.constant 0 : index
    %29 = vector.load %arg5[%c0_24, %c0_25] : memref<1x32xf32, #tpu.memory_space<vmem>>, vector<1x32xf32>
    %cst_26 = arith.constant dense<0.000000e+00> : vector<8x32xf32>
    %30 = tpu.matmul %27, %28, %cst_26 {dimension_numbers = #tpu.dot_dimension_numbers<[1], [0], [0], [1], [0, 0, 1, 1], [], []>} : vector<8x32xf32>, vector<32x32xf32>, vector<8x32xf32> -> vector<8x32xf32>
    %31 = vector.broadcast %29 : vector<1x32xf32> to vector<8x32xf32>
    %32 = arith.addf %30, %31 : vector<8x32xf32>
    %33 = tpu.iota {dimensions = array<i32: 1>} : vector<8x32xi32>
    %cst_27 = arith.constant 5.500000e-01 : f32
    %34 = vector.broadcast %cst_27 : f32 to vector<8x32xf32>
    %35 = arith.addf %32, %34 : vector<8x32xf32>
    %cst_28 = arith.constant 0.000000e+00 : f32
    %36 = vector.broadcast %cst_28 : f32 to vector<8x32xf32>
    %37 = arith.maximumf %35, %36 : vector<8x32xf32>
    %38 = math.absf %35 : vector<8x32xf32>
    %cst_29 = arith.constant 0.000000e+00 : f32
    %39 = vector.broadcast %cst_29 : f32 to vector<8x32xf32>
    %40 = arith.subf %39, %38 : vector<8x32xf32>
    %41 = math.exp %40 : vector<8x32xf32>
    %cst_30 = arith.constant 1.000000e+00 : f32
    %42 = vector.broadcast %cst_30 : f32 to vector<8x32xf32>
    %43 = arith.addf %42, %41 : vector<8x32xf32>
    %44 = math.log %43 : vector<8x32xf32>
    %45 = arith.addf %37, %44 : vector<8x32xf32>
    %cst_31 = arith.constant 1.000000e-01 : f32
    %46 = vector.broadcast %cst_31 : f32 to vector<8x32xf32>
    %47 = arith.addf %45, %46 : vector<8x32xf32>
    %c16_i32 = arith.constant 16 : i32
    %48 = vector.broadcast %c16_i32 : i32 to vector<8x32xi32>
    %49 = arith.cmpi sge, %33, %48 : vector<8x32xi32>
    %50 = arith.select %49, %47, %32 : vector<8x32xi1>, vector<8x32xf32>
    %c0_32 = arith.constant 0 : index
    %c0_33 = arith.constant 0 : index
    %51 = vector.load %arg6[%c0_32, %c0_33] : memref<8x32xf32, #tpu.memory_space<vmem>>, vector<8x32xf32>
    tpu.vector_store %arg6[%c0_32, %c0_33], %50 {strides = array<i32>} : memref<8x32xf32, #tpu.memory_space<vmem>>, vector<8x32xf32>,
    return
  }
  func.func @transform_0(%arg0: i32) -> (i32, i32) {
    %c0_i32 = arith.constant 0 : i32
    %c0_i32_0 = arith.constant 0 : i32
    return %arg0, %c0_i32 : i32, i32
  }
  func.func @transform_1(%arg0: i32) -> (i32, i32, i32) {
    %c0_i32 = arith.constant 0 : i32
    %c0_i32_0 = arith.constant 0 : i32
    %c0_i32_1 = arith.constant 0 : i32
    %c0_i32_2 = arith.constant 0 : i32
    return %c0_i32, %c0_i32_0, %c0_i32_1 : i32, i32, i32
  }
  func.func @transform_2(%arg0: i32) -> (i32, i32, i32) {
    %c0_i32 = arith.constant 0 : i32
    %c0_i32_0 = arith.constant 0 : i32
    %c0_i32_1 = arith.constant 0 : i32
    %c0_i32_2 = arith.constant 0 : i32
    return %c0_i32, %c0_i32_0, %c0_i32_1 : i32, i32, i32
  }
  func.func @transform_3(%arg0: i32) -> (i32, i32) {
    %c0_i32 = arith.constant 0 : i32
    %c0_i32_0 = arith.constant 0 : i32
    %c0_i32_1 = arith.constant 0 : i32
    return %c0_i32, %c0_i32_0 : i32, i32
  }
  func.func @transform_4(%arg0: i32) -> (i32, i32) {
    %c0_i32 = arith.constant 0 : i32
    %c0_i32_0 = arith.constant 0 : i32
    %c0_i32_1 = arith.constant 0 : i32
    return %c0_i32, %c0_i32_0 : i32, i32
  }
  func.func @transform_5(%arg0: i32) -> (i32, i32) {
    %c0_i32 = arith.constant 0 : i32
    %c0_i32_0 = arith.constant 0 : i32
    return %arg0, %c0_i32 : i32, i32
  }
}

</mosaic_0001>

<bundles_post_ra>
// kernel: tpu_custom_call.1
= control target key start
LH: loop header
LB: loop body
LE: loop exit
PB: predicated region body
PF: predicated region fallthrough
CT: control target
= control target key end

     0   :  { %10 = vsyncpa [#allocation3], 0  ;;  %s461_s0 = inlined_call_operand.hbm [shape: f32[8,32], index: 0, kind: input, shape index: {}]   ;;  %s462_s1 = inlined_call_operand.hbm [shape: f32[3,32,32], index: 1, kind: input, shape index: {}]   ;;  %s463_s2 = inlined_call_operand.hbm [shape: f32[3,1,32], index: 2, kind: input, shape index: {}]   ;;  %s464_s3 = inlined_call_operand.hbm [shape: f32[32,32], index: 3, kind: input, shape index: {}]   ;;  %s465_s4 = inlined_call_operand.vmem [shape: f32[1,32], index: 4, kind: input, shape index: {}]   ;;  %s466_s5 = inlined_call_operand.hbm [shape: f32[8,32], index: 5, kind: output, shape index: {}]  }
   0x1   :  { %11 = vsyncpa [#allocation6], 0 }
   0x2   :  { %12 = vsyncpa [#allocation9], 0  ;;  %s29_s20 = sshll.u32 %s462_s1, 4  ;;  %s30_s20 = int_to_ptr.hbm [resolvable:$true] %s29_s20 }
   0x3   :  { %13 = vsyncpa [#allocation4], 0  ;;  %s399_s21 = smov [#allocation5]   ;;  %s19_s25 = sshll.u32 %s461_s0, 4  ;;  %s20_s25 = int_to_ptr.hbm [resolvable:$true] %s19_s25 }
   0x4   :  { %s31_s22 = sshll.u32 %s399_s21, 4  ;;  %s400_s26 = smov 128   ;;  %s32_s22 = int_to_ptr.vmem [resolvable:$true] %s31_s22 }
   0x5   :  { %s401_s27 = smov 8   ;;  %s402_s28 = smov [#allocation2]  }
   0x6   :  { %37 = dma.hbm_to_vmem [thread:$0]  %s30_s20, 1536, %s32_s22, [#allocation6], %s400_s26, %s400_s26, %s401_s27  }
   0x7   :  { %s21_s29 = sshll.u32 %s402_s28, 4  ;;  %s42_s7 = sshll.u32 %s463_s2, 4  ;;  %s22_s29 = int_to_ptr.vmem [resolvable:$true] %s21_s29  ;;  %s43_s7 = int_to_ptr.hbm [resolvable:$true] %s42_s7 }
   0x8   :  { %24 = dma.hbm_to_vmem [thread:$0]  %s20_s25, 128, %s22_s29, [#allocation3]  }
   0x9   :  { %s403_s1 = smov [#allocation7]   ;;  %s55_s0 = sshll.u32 %s464_s3, 4  ;;  %s56_s0 = int_to_ptr.hbm [resolvable:$true] %s55_s0 }
   0xa   :  { %s44_s8 = sshll.u32 %s403_s1, 4  ;;  %s404_s11 = smov 16   ;;  %s45_s8 = int_to_ptr.vmem [resolvable:$true] %s44_s8 }
   0xb   :  { %s405_s12 = smov 1   ;;  %s406_s13 = smov [#allocation8]  }
   0xc   :  { %50 = dma.hbm_to_vmem [thread:$0]  %s43_s7, 48, %s45_s8, [#allocation6], %s404_s11, %s404_s11, %s405_s12  }
   0xd   :  { %s57_s14 = sshll.u32 %s406_s13, 4  ;;  %s58_s14 = int_to_ptr.vmem [resolvable:$true] %s57_s14 }
   0xe   :  { %63 = dma.hbm_to_vmem [thread:$0]  %s56_s0, 512, %s58_s14, [#allocation9], %s400_s26, %s400_s26, %s401_s27  }
   0xf   :  { %391 = dma.done.wait [#allocation3], 128  }
  0x10   :  { %392 = vsyncadd [#allocation3], 4294967168 }
  0x11   :  { %393 = dma.done.wait [#allocation6], 1584  }
  0x12   :  { %394 = vsyncadd [#allocation6], 4294965712 }
  0x13   :  { %395 = dma.done.wait [#allocation9], 512  }
  0x14   :  { %396 = vsyncadd [#allocation9], 4294966784  ;;  %v86_v0 = vld [vmem:[#allocation5 + $0x18] sm:$0xff]  ;;  %v85_v1 = vld [vmem:[#allocation5 + $0x10] sm:$0xff]  ;;  %vm91_vm0 = vcmask 261120   ;;  %v215_v38 = vlaneseq  ;;  %s407_s15 = smov [#allocation10]  }
  0x15   :  { %107 = vmatpush.msra.mxu0 %v86_v0  ;;  %v120_v2 = vld [vmem:[#allocation5 + $0x38] sm:$0xff]  ;;  %v84_v3 = vld [vmem:[#allocation5 + $0x8] sm:$0xff]  ;;  %v83_v4 = vld [vmem:[#allocation5] sm:$0xff]  ;;  %s236_s16 = sshll.u32 %s407_s15, 4  ;;  %s238_s18 = sshll.u32 %s466_s5, 4  ;;  %s237_s16 = int_to_ptr.vmem [resolvable:$true] %s236_s16  ;;  %s239_s18 = int_to_ptr.hbm [resolvable:$true] %s238_s18 }
  0x16   :  { %141 = vmatpush.msra.mxu1 %v120_v2  ;;  %v82_v5 = vld [vmem:[#allocation2] sm:$0xff]  ;;  %v119_v6 = vld [vmem:[#allocation5 + $0x30] sm:$0xff]  ;;  %v118_v7 = vld [vmem:[#allocation5 + $0x28] sm:$0xff]  ;;  %v216_v40 = vand.u32 127, %v215_v38 }
  0x17   :  { %108 = vmatpush.msra.mxu0 %v85_v1  ;;  %v117_v8 = vld [vmem:[#allocation5 + $0x20] sm:$0xff]  ;;  %v154_v9 = vld [vmem:[#allocation5 + $0x58] sm:$0xff]  ;;  %v153_v14 = vld [vmem:[#allocation5 + $0x50] sm:$0xff] }
  0x18   :  { %142 = vmatpush.msra.mxu1 %v119_v6  ;;  %175 = vmatpush.msra.mxu2 %v154_v9  ;;  %v263_v10 = vld [vmem:[#allocation7] ss:$0 sm:$0xff]  ;;  %v152_v15 = vld [vmem:[#allocation5 + $0x48] sm:$0xff]  ;;  %v264_v18 = vld [vmem:[#allocation7 + $0x1] ss:$0 sm:$0xff]  ;;  %vm228_vm1 = vcmp.ge.s32.totalorder %v216_v40, 16 }
  0x19   :  { %109 = vmatpush.msra.mxu0 %v84_v3  ;;  %v151_v16 = vld [vmem:[#allocation5 + $0x40] sm:$0xff]  ;;  %v186_v22 = vld [vmem:[#allocation8 + $0x10] sm:$0xff]  ;;  %v185_v23 = vld [vmem:[#allocation8 + $0x8] sm:$0xff] }
  0x1a   :  { %143 = vmatpush.msra.mxu1 %v118_v7  ;;  %176 = vmatpush.msra.mxu2 %v153_v14  ;;  %v187_v17 = vld [vmem:[#allocation8 + $0x18] sm:$0xff]  ;;  %v184_v24 = vld [vmem:[#allocation8] sm:$0xff]  ;;  %v266_v29 = vld [vmem:[%s465_s4] ss:$0 sm:$0xff] }
  0x1b   :  { %110 = vmatpush.msra.mxu0 %v83_v4  ;;  %207 = vmatpush.msra.mxu3 %v187_v17  ;;  %v265_v25 = vld [vmem:[#allocation7 + $0x2] ss:$0 sm:$0xff] }
  0x1c   :  { %250 = vmatmul.msk.f32.vlgmr.msra.gmra.mxu0 %vm91_vm0, %v82_v5  ;;  %144 = vmatpush.msra.mxu1 %v117_v8 }
  0x1d   :  { %177 = vmatpush.msra.mxu2 %v152_v15  ;;  %208 = vmatpush.msra.mxu3 %v186_v22 }
  0x1f   :  { %178 = vmatpush.msra.mxu2 %v151_v16  ;;  %209 = vmatpush.msra.mxu3 %v185_v23 }
  0x21   :  { %210 = vmatpush.msra.mxu3 %v184_v24 }
  0x99   :  { %v112_v11 = vpop.f32.mrf.mxu0 }
  0x9a   :  { %v113_v12 = vadd.f32 %v263_v10, %v112_v11 }
  0x9c   :  { %v115_v13 = vmax.f32 %v113_v12, 0.0 }
  0x9e   :  { %251 = vmatmul.msk.f32.vlgmr.msra.gmra.mxu1 %vm91_vm0, %v115_v13 }
 0x11b   :  { %v146_v19 = vpop.f32.mrf.mxu1 }
 0x11c   :  { %v147_v20 = vadd.f32 %v264_v18, %v146_v19 }
 0x11e   :  { %v149_v21 = vmax.f32 %v147_v20, 0.0 }
 0x120   :  { %252 = vmatmul.msk.f32.vlgmr.msra.gmra.mxu2 %vm91_vm0, %v149_v21 }
 0x1a3   :  { %v180_v26 = vpop.f32.mrf.mxu2 }
 0x1a4   :  { %v181_v27 = vadd.f32 %v265_v25, %v180_v26 }
 0x1a6   :  { %v183_v28 = vmax.f32 %v181_v27, 0.0 }
 0x1a8   :  { %253 = vmatmul.msk.f32.vlgmr.msra.gmra.mxu3 %vm91_vm0, %v183_v28 }
 0x22b   :  { %v212_v30 = vpop.f32.mrf.mxu3 }
 0x22c   :  { %v213_v31 = vadd.f32 %v266_v29, %v212_v30 }
 0x22e   :  { %v217_v32 = vadd.f32 0.55, %v213_v31 }
 0x230   :  { %v219_v33 = vand.u32 2147483647, %v217_v32  ;;  %v218_v41 = vmax.f32 %v217_v32, 0.0 }
 0x232   :  { %v220_v34 = vsub.f32 0.0, %v219_v33 }
 0x234   :  { %v221_v35 = vmul.f32 1.442695, %v220_v34 }
 0x236   :  { %267 = vpow2.f32 %v221_v35 }
 0x23c   :  { %v268_v36 = vpop.eup %267 }
 0x23d   :  { %v223_v37 = vadd.f32 1.0, %v268_v36 }
 0x23f   :  { %269 = vlog2.f32 %v223_v37 }
 0x245   :  { %v270_v39 = vpop.eup %269 }
 0x246   :  { %v225_v42 = vmul.f32 0.6931472, %v270_v39 }
 0x248   :  { %v226_v43 = vadd.f32 %v225_v42, %v218_v41 }
 0x24a   :  { %v227_v44 = vadd.f32 0.1, %v226_v43 }
 0x24c   :  { %v229_v45 = vsel %vm228_vm1, %v227_v44, %v213_v31 }
 0x24d   :  { %230 = vst.msk [vmem:[#allocation10] sm:$0xff] %vm91_vm0, %v229_v45 }
 0x24e   :  { %241 = dma.vmem_to_hbm [thread:$0]  %s237_s16, 128, %s239_s18, [#allocation4]  }
 0x24f   :  { %397 = dma.done.wait [#allocation4], 128  }
 0x250   :  { %398 = vsyncadd [#allocation4], 4294967168 }
 0x251   :  { %246 = vsyncpa [#allocation3], 1 }
 0x252   :  { %247 = vsyncpa [#allocation6], 1 }
 0x253   :  { %248 = vsyncpa [#allocation9], 1 }
 0x254   :  { %249 = vsyncpa [#allocation4], 1 }

// kernel: tpu_custom_call.1
= control target key start
LH: loop header
LB: loop body
LE: loop exit
PB: predicated region body
PF: predicated region fallthrough
CT: control target
= control target key end

     0   :  { %10 = vsyncpa [#allocation3], 0  ;;  %s461_s0 = inlined_call_operand.hbm [shape: f32[8,32], index: 0, kind: input, shape index: {}]   ;;  %s462_s1 = inlined_call_operand.hbm [shape: f32[3,32,32], index: 1, kind: input, shape index: {}]   ;;  %s463_s2 = inlined_call_operand.hbm [shape: f32[3,1,32], index: 2, kind: input, shape index: {}]   ;;  %s464_s3 = inlined_call_operand.hbm [shape: f32[32,32], index: 3, kind: input, shape index: {}]   ;;  %s465_s4 = inlined_call_operand.vmem [shape: f32[1,32], index: 4, kind: input, shape index: {}]   ;;  %s466_s5 = inlined_call_operand.hbm [shape: f32[8,32], index: 5, kind: output, shape index: {}]  }
   0x1   :  { %11 = vsyncpa [#allocation6], 0 }
   0x2   :  { %12 = vsyncpa [#allocation9], 0  ;;  %s29_s20 = sshll.u32 %s462_s1, 4  ;;  %s30_s20 = int_to_ptr.hbm [resolvable:$true] %s29_s20 }
   0x3   :  { %13 = vsyncpa [#allocation4], 0  ;;  %s399_s21 = smov [#allocation5]   ;;  %s19_s25 = sshll.u32 %s461_s0, 4  ;;  %s20_s25 = int_to_ptr.hbm [resolvable:$true] %s19_s25 }
   0x4   :  { %s31_s22 = sshll.u32 %s399_s21, 4  ;;  %s400_s26 = smov 128   ;;  %s32_s22 = int_to_ptr.vmem [resolvable:$true] %s31_s22 }
   0x5   :  { %s401_s27 = smov 8   ;;  %s402_s28 = smov [#allocation2]  }
   0x6   :  { %37 = dma.hbm_to_vmem [thread:$0]  %s30_s20, 1536, %s32_s22, [#allocation6], %s400_s26, %s400_s26, %s401_s27  }
   0x7   :  { %s21_s29 = sshll.u32 %s402_s28, 4  ;;  %s42_s7 = sshll.u32 %s463_s2, 4  ;;  %s22_s29 = int_to_ptr.vmem [resolvable:$true] %s21_s29  ;;  %s43_s7 = int_to_ptr.hbm [resolvable:$true] %s42_s7 }
   0x8   :  { %24 = dma.hbm_to_vmem [thread:$0]  %s20_s25, 128, %s22_s29, [#allocation3]  }
   0x9   :  { %s403_s1 = smov [#allocation7]   ;;  %s55_s0 = sshll.u32 %s464_s3, 4  ;;  %s56_s0 = int_to_ptr.hbm [resolvable:$true] %s55_s0 }
   0xa   :  { %s44_s8 = sshll.u32 %s403_s1, 4  ;;  %s404_s11 = smov 16   ;;  %s45_s8 = int_to_ptr.vmem [resolvable:$true] %s44_s8 }
   0xb   :  { %s405_s12 = smov 1   ;;  %s406_s13 = smov [#allocation8]  }
   0xc   :  { %50 = dma.hbm_to_vmem [thread:$0]  %s43_s7, 48, %s45_s8, [#allocation6], %s404_s11, %s404_s11, %s405_s12  }
   0xd   :  { %s57_s14 = sshll.u32 %s406_s13, 4  ;;  %s58_s14 = int_to_ptr.vmem [resolvable:$true] %s57_s14 }
   0xe   :  { %63 = dma.hbm_to_vmem [thread:$0]  %s56_s0, 512, %s58_s14, [#allocation9], %s400_s26, %s400_s26, %s401_s27  }
   0xf   :  { %391 = dma.done.wait [#allocation3], 128  }
  0x10   :  { %392 = vsyncadd [#allocation3], 4294967168 }
  0x11   :  { %393 = dma.done.wait [#allocation6], 1584  }
  0x12   :  { %394 = vsyncadd [#allocation6], 4294965712 }
  0x13   :  { %395 = dma.done.wait [#allocation9], 512  }
  0x14   :  { %396 = vsyncadd [#allocation9], 4294966784  ;;  %v86_v0 = vld [vmem:[#allocation5 + $0x18] sm:$0xff]  ;;  %v85_v1 = vld [vmem:[#allocation5 + $0x10] sm:$0xff]  ;;  %vm91_vm0 = vcmask 261120   ;;  %v215_v38 = vlaneseq  ;;  %s407_s15 = smov [#allocation10]  }
  0x15   :  { %107 = vmatpush.msra.mxu0 %v86_v0  ;;  %v120_v2 = vld [vmem:[#allocation5 + $0x38] sm:$0xff]  ;;  %v84_v3 = vld [vmem:[#allocation5 + $0x8] sm:$0xff]  ;;  %v83_v4 = vld [vmem:[#allocation5] sm:$0xff]  ;;  %s236_s16 = sshll.u32 %s407_s15, 4  ;;  %s238_s18 = sshll.u32 %s466_s5, 4  ;;  %s237_s16 = int_to_ptr.vmem [resolvable:$true] %s236_s16  ;;  %s239_s18 = int_to_ptr.hbm [resolvable:$true] %s238_s18 }
  0x16   :  { %141 = vmatpush.msra.mxu1 %v120_v2  ;;  %v82_v5 = vld [vmem:[#allocation2] sm:$0xff]  ;;  %v119_v6 = vld [vmem:[#allocation5 + $0x30] sm:$0xff]  ;;  %v118_v7 = vld [vmem:[#allocation5 + $0x28] sm:$0xff]  ;;  %v216_v40 = vand.u32 127, %v215_v38 }
  0x17   :  { %108 = vmatpush.msra.mxu0 %v85_v1  ;;  %v117_v8 = vld [vmem:[#allocation5 + $0x20] sm:$0xff]  ;;  %v154_v9 = vld [vmem:[#allocation5 + $0x58] sm:$0xff]  ;;  %v153_v14 = vld [vmem:[#allocation5 + $0x50] sm:$0xff] }
  0x18   :  { %142 = vmatpush.msra.mxu1 %v119_v6  ;;  %175 = vmatpush.msra.mxu2 %v154_v9  ;;  %v263_v10 = vld [vmem:[#allocation7] ss:$0 sm:$0xff]  ;;  %v152_v15 = vld [vmem:[#allocation5 + $0x48] sm:$0xff]  ;;  %v264_v18 = vld [vmem:[#allocation7 + $0x1] ss:$0 sm:$0xff]  ;;  %vm228_vm1 = vcmp.ge.s32.totalorder %v216_v40, 16 }
  0x19   :  { %109 = vmatpush.msra.mxu0 %v84_v3  ;;  %v151_v16 = vld [vmem:[#allocation5 + $0x40] sm:$0xff]  ;;  %v186_v22 = vld [vmem:[#allocation8 + $0x10] sm:$0xff]  ;;  %v185_v23 = vld [vmem:[#allocation8 + $0x8] sm:$0xff] }
  0x1a   :  { %143 = vmatpush.msra.mxu1 %v118_v7  ;;  %176 = vmatpush.msra.mxu2 %v153_v14  ;;  %v187_v17 = vld [vmem:[#allocation8 + $0x18] sm:$0xff]  ;;  %v184_v24 = vld [vmem:[#allocation8] sm:$0xff]  ;;  %v266_v29 = vld [vmem:[%s465_s4] ss:$0 sm:$0xff] }
  0x1b   :  { %110 = vmatpush.msra.mxu0 %v83_v4  ;;  %207 = vmatpush.msra.mxu3 %v187_v17  ;;  %v265_v25 = vld [vmem:[#allocation7 + $0x2] ss:$0 sm:$0xff] }
  0x1c   :  { %250 = vmatmul.msk.f32.vlgmr.msra.gmra.mxu0 %vm91_vm0, %v82_v5  ;;  %144 = vmatpush.msra.mxu1 %v117_v8 }
  0x1d   :  { %177 = vmatpush.msra.mxu2 %v152_v15  ;;  %208 = vmatpush.msra.mxu3 %v186_v22 }
  0x1f   :  { %178 = vmatpush.msra.mxu2 %v151_v16  ;;  %209 = vmatpush.msra.mxu3 %v185_v23 }
  0x21   :  { %210 = vmatpush.msra.mxu3 %v184_v24 }
  0x99   :  { %v112_v11 = vpop.f32.mrf.mxu0 }
  0x9a   :  { %v113_v12 = vadd.f32 %v263_v10, %v112_v11 }
  0x9c   :  { %v115_v13 = vmax.f32 %v113_v12, 0.0 }
  0x9e   :  { %251 = vmatmul.msk.f32.vlgmr.msra.gmra.mxu1 %vm91_vm0, %v115_v13 }
 0x11b   :  { %v146_v19 = vpop.f32.mrf.mxu1 }
 0x11c   :  { %v147_v20 = vadd.f32 %v264_v18, %v146_v19 }
 0x11e   :  { %v149_v21 = vmax.f32 %v147_v20, 0.0 }
 0x120   :  { %252 = vmatmul.msk.f32.vlgmr.msra.gmra.mxu2 %vm91_vm0, %v149_v21 }
 0x1a3   :  { %v180_v26 = vpop.f32.mrf.mxu2 }
 0x1a4   :  { %v181_v27 = vadd.f32 %v265_v25, %v180_v26 }
 0x1a6   :  { %v183_v28 = vmax.f32 %v181_v27, 0.0 }
 0x1a8   :  { %253 = vmatmul.msk.f32.vlgmr.msra.gmra.mxu3 %vm91_vm0, %v183_v28 }
 0x22b   :  { %v212_v30 = vpop.f32.mrf.mxu3 }
 0x22c   :  { %v213_v31 = vadd.f32 %v266_v29, %v212_v30 }
 0x22e   :  { %v217_v32 = vadd.f32 0.55, %v213_v31 }
 0x230   :  { %v219_v33 = vand.u32 2147483647, %v217_v32  ;;  %v218_v41 = vmax.f32 %v217_v32, 0.0 }
 0x232   :  { %v220_v34 = vsub.f32 0.0, %v219_v33 }
 0x234   :  { %v221_v35 = vmul.f32 1.442695, %v220_v34 }
 0x236   :  { %267 = vpow2.f32 %v221_v35 }
 0x23c   :  { %v268_v36 = vpop.eup %267 }
 0x23d   :  { %v223_v37 = vadd.f32 1.0, %v268_v36 }
 0x23f   :  { %269 = vlog2.f32 %v223_v37 }
 0x245   :  { %v270_v39 = vpop.eup %269 }
 0x246   :  { %v225_v42 = vmul.f32 0.6931472, %v270_v39 }
 0x248   :  { %v226_v43 = vadd.f32 %v225_v42, %v218_v41 }
 0x24a   :  { %v227_v44 = vadd.f32 0.1, %v226_v43 }
 0x24c   :  { %v229_v45 = vsel %vm228_vm1, %v227_v44, %v213_v31 }
 0x24d   :  { %230 = vst.msk [vmem:[#allocation10] sm:$0xff] %vm91_vm0, %v229_v45 }
 0x24e   :  { %241 = dma.vmem_to_hbm [thread:$0]  %s237_s16, 128, %s239_s18, [#allocation4]  }
 0x24f   :  { %397 = dma.done.wait [#allocation4], 128  }
 0x250   :  { %398 = vsyncadd [#allocation4], 4294967168 }
 0x251   :  { %246 = vsyncpa [#allocation3], 1 }
 0x252   :  { %247 = vsyncpa [#allocation6], 1 }
 0x253   :  { %248 = vsyncpa [#allocation9], 1 }
 0x254   :  { %249 = vsyncpa [#allocation4], 1 }

</bundles_post_ra>
